<compile_context>
chip_gen: v7x
topology: tpu7x:2x2x1
jax: 0.10.0
libtpu: 0.0.40
codegen_flags: <defaults>
</compile_context>

<pallas_src>
import functools
import math

import jax
import jax.numpy as jnp
from jax.experimental import pallas as pl
from jax.experimental.pallas import tpu as pltpu

_EPS = 1e-8  # nn.CosineSimilarity default
_DIMS = (((1,), (1,)), ((), ()))  # contract last dims: x @ y.T


def _cdiv(a, b):
    return (a + b - 1) // b


def _round_up(a, b):
    return _cdiv(a, b) * b


def _vmem_capacity_bytes():
    """Per-TensorCore VMEM capacity; conservative fallback (v7x = 64 MiB)."""
    try:
        info = pltpu.get_tpu_info()
        cap = getattr(info, "vmem_capacity_bytes", None)
        if cap:
            return int(cap)
    except Exception:
        pass
    return 64 << 20


# --------------------------------------------------------------------------
# Row-wise cosine similarity kernels (same-shape / vector-broadcast path).
# --------------------------------------------------------------------------
def _cos_rows_single_kernel(x_ref, y_ref, o_ref, *, inv_temp):
    # Whole feature axis resident: no scratch, no init/finalize branches.
    x = x_ref[...].astype(jnp.float32)   # (tmx, H)
    y = y_ref[...].astype(jnp.float32)   # (tmy, H); tmx/tmy in {tm, 1}
    w12 = jnp.sum(x * y, axis=-1, keepdims=True)
    w1 = jnp.sum(x * x, axis=-1, keepdims=True)
    w2 = jnp.sum(y * y, axis=-1, keepdims=True)
    denom_sq = jnp.maximum(w1 * w2, _EPS * _EPS)   # exact ATen clamp
    o_ref[...] = (w12 * jax.lax.rsqrt(denom_sq) * inv_temp).astype(o_ref.dtype)


def _cos_rows_multi_kernel(x_ref, y_ref, o_ref, w12_ref, w1_ref, w2_ref, *,
                           inv_temp, h_total, tk, mask_tail):
    k = pl.program_id(1)

    @pl.when(k == 0)
    def _():
        w12_ref[...] = jnp.zeros_like(w12_ref)
        w1_ref[...] = jnp.zeros_like(w1_ref)
        w2_ref[...] = jnp.zeros_like(w2_ref)

    x = x_ref[...].astype(jnp.float32)
    y = y_ref[...].astype(jnp.float32)
    if mask_tail:
        # Only the last feature chunk overhangs H; select() kills any garbage.
        colx = jax.lax.broadcasted_iota(jnp.int32, x.shape, 1)
        x = jnp.where(k * tk + colx < h_total, x, 0.0)
        coly = jax.lax.broadcasted_iota(jnp.int32, y.shape, 1)
        y = jnp.where(k * tk + coly < h_total, y, 0.0)

    w12_ref[...] += jnp.sum(x * y, axis=-1, keepdims=True)
    w1_ref[...] += jnp.sum(x * x, axis=-1, keepdims=True)
    w2_ref[...] += jnp.sum(y * y, axis=-1, keepdims=True)

    @pl.when(k == pl.num_programs(1) - 1)
    def _():
        denom_sq = jnp.maximum(w1_ref[...] * w2_ref[...], _EPS * _EPS)
        o_ref[...] = (w12_ref[...] * jax.lax.rsqrt(denom_sq) * inv_temp
                      ).astype(o_ref.dtype)


def _cosine_rows(x2, y2, temp, out_dtype):
    """x2:(Mx,H), y2:(My,H) with Mx,My in {1,M}; returns (M,) = cos/temp."""
    Mx, H = x2.shape
    My, H2 = y2.shape
    assert H == H2
    M = max(Mx, My)

    if H <= 4096:
        tk, grid_k = H, 1
    else:
        tk = 512
        grid_k = _cdiv(H, tk)
    mask_tail = (H % tk) != 0

    cap = _vmem_capacity_bytes()
    input_budget = (cap * 3) // 8                    # ~48 MiB on 128-MiB parts, ~24 MiB on v7x
    vmem_limit = max(32 << 20, min((cap * 3) // 4, cap - (16 << 20)))

    itemsize = max(jnp.dtype(x2.dtype).itemsize, jnp.dtype(y2.dtype).itemsize)
    n_streamed = (int(Mx == M) + int(My == M)) if M > 1 else 2
    n_streamed = max(n_streamed, 1)
    per_row_bytes = 2 * n_streamed * tk * itemsize   # 2 pipeline buffers / streamed input
    tm = int(min(2048, max(32, input_budget // per_row_bytes)))
    tm = (tm // 32) * 32
    if M >= 64:
        # >= 2 blocks on the 'parallel' axis (v7x: 2 TensorCores share it).
        tm = min(tm, _round_up(_cdiv(M, 2), 32))
    else:
        tm = _round_up(M, 8)
    tm = max(tm, 8)
    grid_m = _cdiv(M, tm)

    x_streamed = (Mx == M)
    y_streamed = (My == M)
    tmx = tm if x_streamed else 1
    tmy = tm if y_streamed else 1

    inv_temp = float(1.0 / temp)
    params = pltpu.CompilerParams(
        dimension_semantics=("parallel",) if grid_k == 1 else ("parallel", "arbitrary"),
        vmem_limit_bytes=int(vmem_limit),
    )

    if grid_k == 1:
        x_map = (lambda i: (i, 0)) if x_streamed else (lambda i: (0, 0))
        y_map = (lambda i: (i, 0)) if y_streamed else (lambda i: (0, 0))
        kernel = functools.partial(_cos_rows_single_kernel, inv_temp=inv_temp)
        out = pl.pallas_call(
            kernel,
            out_shape=jax.ShapeDtypeStruct((M, 1), out_dtype),
            grid=(grid_m,),
            in_specs=[
                pl.BlockSpec((tmx, tk), x_map),
                pl.BlockSpec((tmy, tk), y_map),
            ],
            out_specs=pl.BlockSpec((tm, 1), lambda i: (i, 0)),
            compiler_params=params,
        )(x2, y2)
    else:
        x_map = (lambda i, k: (i, k)) if x_streamed else (lambda i, k: (0, k))
        y_map = (lambda i, k: (i, k)) if y_streamed else (lambda i, k: (0, k))
        kernel = functools.partial(_cos_rows_multi_kernel, inv_temp=inv_temp,
                                   h_total=H, tk=tk, mask_tail=mask_tail)
        out = pl.pallas_call(
            kernel,
            out_shape=jax.ShapeDtypeStruct((M, 1), out_dtype),
            grid=(grid_m, grid_k),
            in_specs=[
                pl.BlockSpec((tmx, tk), x_map),
                pl.BlockSpec((tmy, tk), y_map),
            ],
            out_specs=pl.BlockSpec((tm, 1), lambda i, k: (i, 0)),
            scratch_shapes=[
                pltpu.VMEM((tm, 1), jnp.float32),
                pltpu.VMEM((tmx, 1), jnp.float32),
                pltpu.VMEM((tmy, 1), jnp.float32),
            ],
            compiler_params=params,
        )(x2, y2)
    return out[:, 0]


# --------------------------------------------------------------------------
# SimCSE cross-similarity kernels: x:(B1,H) vs y:(B2,H) -> (B1,B2) on the MXU.
# Norms are a tiny f32 prepass passed in; the kernel only does the matmul.
# --------------------------------------------------------------------------
def _cos_cross_single_kernel(x_ref, y_ref, sqx_ref, sqy_ref, o_ref, *,
                             inv_temp, precision):
    # Native-dtype matmul (single MXU pass for bf16), f32 accumulation.
    p = jax.lax.dot_general(x_ref[...], y_ref[...], _DIMS,
                            precision=precision,
                            preferred_element_type=jnp.float32)
    denom_sq = jnp.maximum(sqx_ref[...] * sqy_ref[...], _EPS * _EPS)
    o_ref[...] = (p * jax.lax.rsqrt(denom_sq) * inv_temp).astype(o_ref.dtype)


def _cos_cross_multi_kernel(x_ref, y_ref, sqx_ref, sqy_ref, o_ref, acc_ref, *,
                            inv_temp, precision, h_total, tk, mask_tail):
    k = pl.program_id(2)

    @pl.when(k == 0)
    def _():
        acc_ref[...] = jnp.zeros_like(acc_ref)

    x = x_ref[...]
    y = y_ref[...]
    if mask_tail:
        # Zeroing x's overhanging lanes is enough for the dot product.
        col = jax.lax.broadcasted_iota(jnp.int32, x.shape, 1)
        x = jnp.where(k * tk + col < h_total, x, jnp.zeros_like(x))

    acc_ref[...] += jax.lax.dot_general(x, y, _DIMS,
                                        precision=precision,
                                        preferred_element_type=jnp.float32)

    @pl.when(k == pl.num_programs(2) - 1)
    def _():
        denom_sq = jnp.maximum(sqx_ref[...] * sqy_ref[...], _EPS * _EPS)
        o_ref[...] = (acc_ref[...] * jax.lax.rsqrt(denom_sq) * inv_temp
                      ).astype(o_ref.dtype)


def _cosine_cross(xr, yr, temp, out_dtype, *, precision, tm_max=512, tn_max=256):
    """xr:(B1,H), yr:(B2,H) -> (B1,B2) with out[i,j] = cos(x_i, y_j)/temp."""
    B1, H = xr.shape
    B2, H2 = yr.shape
    assert H == H2

    # Keep the matmul single-dtype (mixed dtypes only in the rare mixed case).
    cdt = jnp.result_type(xr.dtype, yr.dtype)
    if xr.dtype != cdt:
        xr = xr.astype(cdt)
    if yr.dtype != cdt:
        yr = yr.astype(cdt)

    # Tiny O(B*H) f32 norm prepass (keeps norms full-precision even for bf16).
    sqx = jnp.sum(jnp.square(xr.astype(jnp.float32)), axis=-1, keepdims=True)  # (B1,1)
    sqy = jnp.sum(jnp.square(yr.astype(jnp.float32)), axis=-1)[None, :]        # (1,B2)

    # Tiles: output lane tile multiple of 128 (lane-dense stores, full MXU
    # columns); rows multiple of 8; >=2 i-blocks when B1 allows (v7x: 2 TCs).
    if B1 <= 16:
        tm = _round_up(B1, 8)
    elif B1 <= tm_max:
        tm = _round_up(_cdiv(B1, 2), 8)
    else:
        tm = tm_max
    tn = min(tn_max, _round_up(B2, 128))

    if H <= 2048:
        tk, grid_k = H, 1
    else:
        tk = 1024
        grid_k = _cdiv(H, tk)
    mask_tail = (H % tk) != 0

    grid_i = _cdiv(B1, tm)
    grid_j = _cdiv(B2, tn)

    inv_temp = float(1.0 / temp)
    itemsize = jnp.dtype(cdt).itemsize
    est = 2 * (tm * tk + tn * tk) * itemsize + 3 * tm * tn * 4
    vmem_limit = int(min(48 << 20, max(32 << 20, 2 * est)))

    if grid_k == 1:
        kernel = functools.partial(_cos_cross_single_kernel,
                                   inv_temp=inv_temp, precision=precision)
        out = pl.pallas_call(
            kernel,
            out_shape=jax.ShapeDtypeStruct((B1, B2), out_dtype),
            grid=(grid_i, grid_j),
            in_specs=[
                pl.BlockSpec((tm, tk), lambda i, j: (i, 0)),
                pl.BlockSpec((tn, tk), lambda i, j: (j, 0)),
                pl.BlockSpec((tm, 1), lambda i, j: (i, 0)),
                pl.BlockSpec((1, tn), lambda i, j: (0, j)),
            ],
            out_specs=pl.BlockSpec((tm, tn), lambda i, j: (i, j)),
            compiler_params=pltpu.CompilerParams(
                dimension_semantics=("parallel", "parallel"),
                vmem_limit_bytes=vmem_limit,
            ),
        )(xr, yr, sqx, sqy)
    else:
        kernel = functools.partial(_cos_cross_multi_kernel,
                                   inv_temp=inv_temp, precision=precision,
                                   h_total=H, tk=tk, mask_tail=mask_tail)
        out = pl.pallas_call(
            kernel,
            out_shape=jax.ShapeDtypeStruct((B1, B2), out_dtype),
            grid=(grid_i, grid_j, grid_k),
            in_specs=[
                pl.BlockSpec((tm, tk), lambda i, j, k: (i, k)),
                pl.BlockSpec((tn, tk), lambda i, j, k: (j, k)),
                pl.BlockSpec((tm, 1), lambda i, j, k: (i, 0)),
                pl.BlockSpec((1, tn), lambda i, j, k: (0, j)),
            ],
            out_specs=pl.BlockSpec((tm, tn), lambda i, j, k: (i, j)),
            scratch_shapes=[pltpu.VMEM((tm, tn), jnp.float32)],
            compiler_params=pltpu.CompilerParams(
                dimension_semantics=("parallel", "parallel", "arbitrary"),
                vmem_limit_bytes=vmem_limit,
            ),
        )(xr, yr, sqx, sqy)
    return out


# --------------------------------------------------------------------------
# Public wrapper: same semantics as CosineSimilarityFunction(temp)(x, y).
# --------------------------------------------------------------------------
def cosine_similarity_fn(x, y, temp, precision=None):
    x = jnp.asarray(x)
    y = jnp.asarray(y)
    out_dtype = jnp.result_type(x.dtype, y.dtype)
    if not jnp.issubdtype(out_dtype, jnp.floating):
        out_dtype = jnp.float32
    if precision is None:
        # f32 inputs default to multi-pass accuracy; bf16 runs single-pass MXU.
        precision = (jax.lax.Precision.HIGHEST if out_dtype == jnp.float32
                     else jax.lax.Precision.DEFAULT)

    # SimCSE cross pattern: never materialize the (B1,B2,H) broadcast; all the
    # O(B1*B2*H) work goes to the MXU.
    if x.ndim == 3 and y.ndim == 3 and x.shape[-1] == y.shape[-1]:
        if x.shape[1] == 1 and y.shape[0] == 1:
            return _cosine_cross(x[:, 0, :], y[0], float(temp), out_dtype,
                                 precision=precision)
        if x.shape[0] == 1 and y.shape[1] == 1:
            # out[i, j] = cos(y[i, 0], x[0, j]) = cos(x[0, j], y[i, 0])
            return _cosine_cross(y[:, 0, :], x[0], float(temp), out_dtype,
                                 precision=precision)

    # General path.
    full_shape = jnp.broadcast_shapes(x.shape, y.shape)
    lead = full_shape[:-1]
    H = full_shape[-1]
    M = math.prod(lead) if lead else 1

    def _rows_of(a):
        """Return (L,H) view with L in {1,M} when no HBM copy is needed."""
        if a.shape[-1] != H:
            return None                                   # broadcasts on the feature axis
        lead_a = a.shape[:-1]
        if all(d == 1 for d in lead_a):
            return a.reshape(1, H)                        # pure vector broadcast
        if (1,) * (len(lead) - len(lead_a)) + tuple(lead_a) == tuple(lead):
            return a.reshape(M, H)                        # exact (free reshape)
        return None

    xr = _rows_of(x)
    yr = _rows_of(y)
    # TODO(synk): index-map broadcast for partially-broadcast leading dims
    # (rare); such inputs fall back to an XLA broadcast materialization.
    if xr is None:
        xr = jnp.broadcast_to(x, full_shape).reshape(M, H)
    if yr is None:
        yr = jnp.broadcast_to(y, full_shape).reshape(M, H)

    out = _cosine_rows(xr, yr, float(temp), out_dtype)
    return out.reshape(lead)


class CosineSimilarityFunction:
    """Pallas-TPU equivalent of the PyTorch module."""

    def __init__(self, temp, precision=None):
        self.temp = temp
        self.precision = precision

    def __call__(self, x, y):
        return cosine_similarity_fn(x, y, self.temp, precision=self.precision)


def _reference(x, y, temp):
    xf = x.astype(jnp.float32)
    yf = y.astype(jnp.float32)
    w12 = jnp.sum(xf * yf, axis=-1)
    w1 = jnp.sum(xf * xf, axis=-1)
    w2 = jnp.sum(yf * yf, axis=-1)
    return w12 / jnp.sqrt(jnp.maximum(w1 * w2, _EPS * _EPS)) / temp


if __name__ == "__main__":
    key = jax.random.PRNGKey(0)
    kx, ky, ka, kb, kc = jax.random.split(key, 5)

    temp = 0.05
    B, H = 8, 32
    mod = CosineSimilarityFunction(temp)

    # 1) SimCSE cross pattern: (B,1,H) vs (1,B,H) -> (B,B) via the MXU kernel.
    x = jax.random.normal(kx, (B, 1, H), dtype=jnp.float32)
    y = jax.random.normal(ky, (1, B, H), dtype=jnp.float32)
    out = jax.block_until_ready(mod(x, y))
    ref = _reference(jnp.broadcast_to(x, (B, B, H)),
                     jnp.broadcast_to(y, (B, B, H)), temp)
    assert out.shape == (B, B)
    assert jnp.allclose(out, ref, atol=2e-4, rtol=2e-4)

    # Swapped-order cross pattern (other dispatch branch).
    out2 = jax.block_until_ready(mod(y, x))
    assert out2.shape == (B, B)
    assert jnp.allclose(out2, ref, atol=2e-4, rtol=2e-4)

    # bf16 cross pattern: native single-pass MXU path.
    out_bf = jax.block_until_ready(mod(x.astype(jnp.bfloat16),
                                       y.astype(jnp.bfloat16)))
    assert out_bf.shape == (B, B) and out_bf.dtype == jnp.bfloat16
    assert jnp.allclose(out_bf.astype(jnp.float32), ref, atol=0.5, rtol=0.05)

    # 2) Same-shape (row-wise) path.
    a = jax.random.normal(ka, (2, 4, 16, H), dtype=jnp.float32)
    b = jax.random.normal(kb, (2, 4, 16, H), dtype=jnp.float32)
    out3 = jax.block_until_ready(mod(a, b))
    ref3 = _reference(a, b, temp)
    assert out3.shape == (2, 4, 16)
    assert jnp.allclose(out3, ref3, atol=1e-4, rtol=1e-4)

    # 3) Vector-broadcast path: (6,H) vs (H,) with no HBM broadcast copy.
    c = jax.random.normal(kc, (6, H), dtype=jnp.float32)
    v = jax.random.normal(ky, (H,), dtype=jnp.float32)
    out4 = jax.block_until_ready(mod(c, v))
    ref4 = _reference(c, jnp.broadcast_to(v, (6, H)), temp)
    assert out4.shape == (6,)
    assert jnp.allclose(out4, ref4, atol=1e-4, rtol=1e-4)

    print("KERNEL_OK")
</pallas_src>

<mosaic_0001>
module attributes {stable_mosaic.version = 11 : i64} {
  func.func @_cos_cross_single_kernel(%arg0: i32, %arg1: i32, %arg2: memref<8x32xf32, #tpu.memory_space<vmem>>, %arg3: memref<128x32xf32, #tpu.memory_space<vmem>>, %arg4: memref<8x1xf32, #tpu.memory_space<vmem>>, %arg5: memref<1x128xf32, #tpu.memory_space<vmem>>, %arg6: memref<8x128xf32, #tpu.memory_space<vmem>>) attributes {dimension_semantics = [#tpu.dimension_semantics<parallel>, #tpu.dimension_semantics<parallel>], iteration_bounds = array<i64: 1, 1>, scalar_prefetch = 0 : i64, scratch_operands = 0 : i64, tpu.core_type = #tpu.core_type<tc>, window_params = [{transform_indices = @transform_0, window_bounds = array<i64: 8, 32>}, {transform_indices = @transform_1, window_bounds = array<i64: 128, 32>}, {transform_indices = @transform_2, window_bounds = array<i64: 8, 1>}, {transform_indices = @transform_3, window_bounds = array<i64: 1, 128>}, {transform_indices = @transform_4, window_bounds = array<i64: 8, 128>}]} {
    %c0 = arith.constant 0 : index
    %c0_0 = arith.constant 0 : index
    %0 = vector.load %arg2[%c0, %c0_0] : memref<8x32xf32, #tpu.memory_space<vmem>>, vector<8x32xf32>
    %c0_1 = arith.constant 0 : index
    %c0_2 = arith.constant 0 : index
    %1 = vector.load %arg3[%c0_1, %c0_2] : memref<128x32xf32, #tpu.memory_space<vmem>>, vector<128x32xf32>
    %cst = arith.constant dense<0.000000e+00> : vector<8x128xf32>
    %2 = tpu.matmul %0, %1, %cst {dimension_numbers = #tpu.dot_dimension_numbers<[1], [1], [0], [0], [0, 0, 1, 0], [], []>, precision = #tpu.contract_precision<fp32>} : vector<8x32xf32>, vector<128x32xf32>, vector<8x128xf32> -> vector<8x128xf32>
    %c0_3 = arith.constant 0 : index
    %c0_4 = arith.constant 0 : index
    %3 = vector.load %arg4[%c0_3, %c0_4] : memref<8x1xf32, #tpu.memory_space<vmem>>, vector<8x1xf32>
    %c0_5 = arith.constant 0 : index
    %c0_6 = arith.constant 0 : index
    %4 = vector.load %arg5[%c0_5, %c0_6] : memref<1x128xf32, #tpu.memory_space<vmem>>, vector<1x128xf32>
    %5 = vector.broadcast %3 : vector<8x1xf32> to vector<8x128xf32>
    %6 = vector.broadcast %4 : vector<1x128xf32> to vector<8x128xf32>
    %7 = arith.mulf %5, %6 : vector<8x128xf32>
    %cst_7 = arith.constant 1.000000e-16 : f32
    %8 = vector.broadcast %cst_7 : f32 to vector<8x128xf32>
    %9 = arith.maximumf %7, %8 : vector<8x128xf32>
    %10 = math.rsqrt %9 : vector<8x128xf32>
    %11 = arith.mulf %2, %10 : vector<8x128xf32>
    %cst_8 = arith.constant 2.000000e+01 : f32
    %12 = vector.broadcast %cst_8 : f32 to vector<8x128xf32>
    %13 = arith.mulf %11, %12 : vector<8x128xf32>
    %c0_9 = arith.constant 0 : index
    %c0_10 = arith.constant 0 : index
    %14 = vector.load %arg6[%c0_9, %c0_10] : memref<8x128xf32, #tpu.memory_space<vmem>>, vector<8x128xf32>
    tpu.vector_store %arg6[%c0_9, %c0_10], %13 {strides = array<i32>} : memref<8x128xf32, #tpu.memory_space<vmem>>, vector<8x128xf32>,
    return
  }
  func.func @transform_0(%arg0: i32, %arg1: i32) -> (i32, i32) {
    %c0_i32 = arith.constant 0 : i32
    %c0_i32_0 = arith.constant 0 : i32
    return %arg0, %c0_i32 : i32, i32
  }
  func.func @transform_1(%arg0: i32, %arg1: i32) -> (i32, i32) {
    %c0_i32 = arith.constant 0 : i32
    %c0_i32_0 = arith.constant 0 : i32
    return %arg1, %c0_i32 : i32, i32
  }
  func.func @transform_2(%arg0: i32, %arg1: i32) -> (i32, i32) {
    %c0_i32 = arith.constant 0 : i32
    %c0_i32_0 = arith.constant 0 : i32
    return %arg0, %c0_i32 : i32, i32
  }
  func.func @transform_3(%arg0: i32, %arg1: i32) -> (i32, i32) {
    %c0_i32 = arith.constant 0 : i32
    %c0_i32_0 = arith.constant 0 : i32
    return %c0_i32, %arg1 : i32, i32
  }
  func.func @transform_4(%arg0: i32, %arg1: i32) -> (i32, i32) {
    %c0_i32 = arith.constant 0 : i32
    return %arg0, %arg1 : i32, i32
  }
}

</mosaic_0001>

<bundles_post_ra>
// kernel: tpu_custom_call.1
= control target key start
LH: loop header
LB: loop body
LE: loop exit
PB: predicated region body
PF: predicated region fallthrough
CT: control target
= control target key end

     0   :  { %9 = vsyncpa [#allocation3], 0  ;;  %s1599_s0 = inlined_call_operand.vmem [shape: f32[8,32], index: 0, kind: input, shape index: {}]   ;;  %s1600_s1 = inlined_call_operand.hbm [shape: f32[8,32], index: 1, kind: input, shape index: {}]   ;;  %s1601_s2 = inlined_call_operand.vmem [shape: f32[8,1], index: 2, kind: input, shape index: {}]   ;;  %s1602_s3 = inlined_call_operand.vmem [shape: f32[1,8], index: 3, kind: input, shape index: {}]   ;;  %s1603_s4 = inlined_call_operand.hbm [shape: f32[8,8], index: 4, kind: output, shape index: {}]  }
   0x1   :  { %10 = vsyncpa [#allocation4], 0 }
   0x2   :  { %17 = vsyncadd [#allocation3], 1920  ;;  %s1301_s15 = smov [#allocation2]   ;;  %s1253_s19 = scalar_lea.hbm %s1600_s1, 128 }
   0x3   :  { %s18_s16 = sshll.u32 %s1301_s15, 4  ;;  %p1254_p0 = scmp.ne.s32.totalorder %s1600_s1, %s1253_s19  ;;  %s19_s16 = int_to_ptr.vmem [resolvable:$true] %s18_s16 }
   0x4   :  { %p1257_p1 = scmp.lt.u32.totalorder %s1253_s19, %s1600_s1 }
   0x6   :  { %p1259_p2 = pnand %p1257_p1, %p1254_p0 }
   0x8   :  { %1262 = shalt.err (!%p1259_p2)
}
   0x9   :  { %s1263_s24 = scalar_lea.vmem %s19_s16, 128  ;;  %s1267_s25 = scalar_lea.vmem %s19_s16, 2048 }
   0xa   :  { %p1264_p3 = scmp.ne.s32.totalorder %s19_s16, %s1263_s24  ;;  %p1268_p4 = scmp.lt.s32.totalorder %s19_s16, %s19_s16 }
   0xb   :  { %p1269_p5 = scmp.lt.s32.totalorder %s1267_s25, %s1263_s24 }
   0xd   :  { %p1270_p6 = por %p1269_p5, %p1268_p4 }
   0xf   :  { %p1271_p7 = pnand %p1270_p6, %p1264_p3 }
  0x11   :  { %1274 = shalt.err (!%p1271_p7)
}
  0x12   :  { %s1302_s26 = smov 128   ;;  %s1303_s27 = smov 8  }
  0x13   :  { %24 = dma.hbm_to_vmem [thread:$0]  %s1600_s1, 128, %s19_s16, [#allocation3], %s1302_s26, %s1302_s26, %s1303_s27  }
  0x14   :  { %1297 = dma.done.wait [#allocation3], 2048  }
  0x15   :  { %1298 = vsyncadd [#allocation3], 4294965248  ;;  %v1304_v0 = vmov 0.0|0.0   ;;  %vm1305_vm0 = vmmov 0   ;;  %v1306_v1 = vmov 0.0   ;;  %vm49_vm1 = vcmask 261120  }
  0x16   :  { %1089 = vmatprep.subr.bf16.mxu1 %v1304_v0  ;;  %1161 = vmatprep.subr.bf16.mxu0 %v1304_v0  ;;  %v33_v2 = vld [vmem:[#allocation2] sm:$0xff]  ;;  %v34_v3 = vld [vmem:[#allocation2 + $0x8] sm:$0xff]  ;;  %v35_v4 = vld [vmem:[#allocation2 + $0x10] sm:$0xff]  ;;  %s1308_s7 = smov [#allocation5]  }
  0x17   :  { %911 = vmatprep.mubr.msk.f32.mxu1 %vm1305_vm0, %v1306_v1  ;;  %1016 = vmatprep.mubr.msk.f32.mxu0 %vm1305_vm0, %v1306_v1  ;;  %v54_v5 = vsel %vm49_vm1, %v33_v2, 0  ;;  %v57_v6 = vsel %vm49_vm1, %v34_v3, 0  ;;  %v36_v7 = vld [vmem:[#allocation2 + $0x18] sm:$0xff]  ;;  %v60_v10 = vsel %vm49_vm1, %v35_v4, 0  ;;  %v37_v15 = vld [vmem:[#allocation2 + $0x20] sm:$0xff]  ;;  %v38_v16 = vld [vmem:[#allocation2 + $0x28] sm:$0xff] }
  0x18   :  { %v102_v8 = vand.u32 4294901760, %v54_v5  ;;  %v105_v9 = vand.u32 4294901760, %v57_v6  ;;  %v63_v11 = vsel %vm49_vm1, %v36_v7, 0  ;;  %v108_v13 = vand.u32 4294901760, %v60_v10  ;;  %v39_v22 = vld [vmem:[#allocation2 + $0x30] sm:$0xff]  ;;  %v40_v23 = vld [vmem:[#allocation2 + $0x38] sm:$0xff] }
  0x19   :  { %v111_v14 = vand.u32 4294901760, %v63_v11  ;;  %v66_v18 = vsel %vm49_vm1, %v37_v15, 0  ;;  %v69_v19 = vsel %vm49_vm1, %v38_v16, 0  ;;  %v72_v25 = vsel %vm49_vm1, %v39_v22, 0  ;;  %v41_v29 = vld [vmem:[#allocation2 + $0x40] sm:$0xff]  ;;  %v42_v30 = vld [vmem:[#allocation2 + $0x48] sm:$0xff] }
  0x1a   :  { %v1356_v12 = vpack.c.bf16 %v105_v9, %v102_v8  ;;  %v114_v20 = vand.u32 4294901760, %v66_v18  ;;  %v117_v21 = vand.u32 4294901760, %v69_v19  ;;  %v75_v26 = vsel %vm49_vm1, %v40_v23, 0  ;;  %v43_v40 = vld [vmem:[#allocation2 + $0x50] sm:$0xff]  ;;  %v44_v41 = vld [vmem:[#allocation2 + $0x58] sm:$0xff]  ;;  %v45_v60 = vld [vmem:[#allocation2 + $0x60] sm:$0xff] }
  0x1b   :  { %v1362_v17 = vpack.c.bf16 %v111_v14, %v108_v13  ;;  %v120_v27 = vand.u32 4294901760, %v72_v25  ;;  %v123_v28 = vand.u32 4294901760, %v75_v26  ;;  %v78_v32 = vsel %vm49_vm1, %v41_v29, 0  ;;  %v46_v61 = vld [vmem:[#allocation2 + $0x68] sm:$0xff]  ;;  %s767_s8 = sshll.u32 %s1308_s7, 4  ;;  %s768_s8 = int_to_ptr.vmem [resolvable:$true] %s767_s8 }
  0x1c   :  { %1091 = vmatpush3.bf16.xpose.msra.mxu1 %v1356_v12  ;;  %1163 = vmatpush3.bf16.xpose.msra.mxu0 %v1356_v12  ;;  %v1370_v24 = vpack.c.bf16 %v117_v21, %v114_v20  ;;  %v81_v33 = vsel %vm49_vm1, %v42_v30, 0  ;;  %v1382_v34 = vsub.f32 %v54_v5, %v102_v8  ;;  %v1384_v35 = vsub.f32 %v57_v6, %v105_v9  ;;  %v32_v6 = vld [vmem:[%s1599_s0] sm:$0xff]  ;;  %v47_v9 = vld [vmem:[#allocation2 + $0x70] sm:$0xff]  ;;  %s1275_s9 = scalar_lea.vmem %s768_s8, 128  ;;  %p1280_p9 = scmp.lt.s32.totalorder %s768_s8, %s768_s8 }
  0x1d   :  { %1092 = vmatprep.subr.bf16.mxu1 %v1304_v0  ;;  %1164 = vmatprep.subr.bf16.mxu0 %v1304_v0  ;;  %v1378_v31 = vpack.c.bf16 %v123_v28, %v120_v27  ;;  %v1386_v36 = vsub.f32 %v60_v10, %v108_v13  ;;  %v1388_v37 = vsub.f32 %v63_v11, %v111_v14  ;;  %v126_v38 = vand.u32 4294901760, %v78_v32  ;;  %v48_v10 = vld [vmem:[#allocation2 + $0x78] sm:$0xff]  ;;  %p1276_p8 = scmp.ne.s32.totalorder %s768_s8, %s1275_s9  ;;  %p1281_p10 = scmp.lt.s32.totalorder %s1275_s9, %s1275_s9 }
  0x1e   :  { %v129_v39 = vand.u32 4294901760, %v81_v33  ;;  %v1138_v42 = vpack.c.bf16 %v1384_v35, %v1382_v34  ;;  %v1392_v43 = vsub.f32 %v66_v18, %v114_v20  ;;  %v1394_v44 = vsub.f32 %v69_v19, %v117_v21 }
  0x1f   :  { %v1397_v45 = vsub.f32 %v72_v25, %v120_v27  ;;  %v1400_v46 = vsub.f32 %v75_v26, %v123_v28  ;;  %v1404_v47 = vsub.f32 %v78_v32, %v126_v38  ;;  %v84_v49 = vsel %vm49_vm1, %v43_v40, 0  ;;  %p1282_p11 = por %p1281_p10, %p1280_p9 }
  0x20   :  { %v1406_v48 = vsub.f32 %v81_v33, %v129_v39  ;;  %v87_v50 = vsel %vm49_vm1, %v44_v41, 0  ;;  %v1141_v51 = vpack.c.bf16 %v1388_v37, %v1386_v36  ;;  %v1144_v52 = vpack.c.bf16 %v1394_v44, %v1392_v43 }
  0x21   :  { %v1147_v53 = vpack.c.bf16 %v1400_v46, %v1397_v45  ;;  %v1418_v55 = vpack.c.bf16 %v129_v39, %v126_v38  ;;  %v132_v56 = vand.u32 4294901760, %v84_v49  ;;  %v135_v57 = vand.u32 4294901760, %v87_v50  ;;  %p1283_p12 = pnand %p1282_p11, %p1276_p8 }
  0x22   :  { %v1150_v54 = vpack.c.bf16 %v1406_v48, %v1404_v47  ;;  %v90_v63 = vsel %vm49_vm1, %v45_v60, 0  ;;  %v93_v2 = vsel %vm49_vm1, %v46_v61, 0  ;;  %v51_v11 = vsel %vm49_vm1, %v32_v6, 0 }
  0x23   :  { %v1420_v58 = vsub.f32 %v84_v49, %v132_v56  ;;  %v1422_v59 = vsub.f32 %v87_v50, %v135_v57  ;;  %v1432_v3 = vpack.c.bf16 %v135_v57, %v132_v56  ;;  %v138_v4 = vand.u32 4294901760, %v90_v63 }
  0x24   :  { %1094 = vmatpush3.bf16.xpose.msra.mxu1 %v1362_v17  ;;  %1166 = vmatpush3.bf16.xpose.msra.mxu0 %v1362_v17  ;;  %v141_v5 = vand.u32 4294901760, %v93_v2  ;;  %v96_v14 = vsel %vm49_vm1, %v47_v9, 0  ;;  %v99_v15 = vsel %vm49_vm1, %v48_v10, 0  ;;  %v1450_v16 = vand.u32 4294901760, %v51_v11 }
  0x25   :  { %1095 = vmatprep.subr.bf16.mxu1 %v1304_v0  ;;  %1167 = vmatprep.subr.bf16.mxu0 %v1304_v0  ;;  %v1153_v62 = vpack.c.bf16 %v1422_v59, %v1420_v58  ;;  %v1437_v7 = vsub.f32 %v90_v63, %v138_v4  ;;  %v144_v19 = vand.u32 4294901760, %v96_v14  ;;  %v147_v20 = vand.u32 4294901760, %v99_v15 }
  0x26   :  { %v1439_v8 = vsub.f32 %v93_v2, %v141_v5  ;;  %v1452_v18 = vpack.c.bf16 %v141_v5, %v138_v4  ;;  %v1459_v23 = vsub.f32 %v51_v11, %v1450_v16  ;;  %v195_v25 = vand.u32 4294901760, %v1382_v34  ;;  %v742_v5 = vld [vmem:[%s1601_s2] sm:$0xff] }
  0x27   :  { %v1454_v21 = vsub.f32 %v96_v14, %v144_v19  ;;  %v1456_v22 = vsub.f32 %v99_v15, %v147_v20  ;;  %v202_v26 = vand.u32 4294901760, %v1384_v35  ;;  %v1470_v29 = vpack.c.bf16 %v147_v20, %v144_v19 }
  0x28   :  { %v1156_v13 = vpack.c.bf16 %v1439_v8, %v1437_v7  ;;  %v184_v28 = vand.u32 4294901760, %v1459_v23  ;;  %v196_v30 = vsub.f32 %v1382_v34, %v195_v25  ;;  %v209_v40 = vand.u32 4294901760, %v1386_v36 }
  0x29   :  { %v1159_v27 = vpack.c.bf16 %v1456_v22, %v1454_v21  ;;  %v203_v32 = vsub.f32 %v1384_v35, %v202_v26  ;;  %v216_v41 = vand.u32 4294901760, %v1388_v37  ;;  %v1186_v56 = vpack.c.bf16 %v202_v26, %v195_v25 }
  0x2a   :  { %v185_v33 = vsub.f32 %v1459_v23, %v184_v28  ;;  %v197_v38 = vand.u32 4294901760, %v196_v30  ;;  %v210_v57 = vsub.f32 %v1386_v36, %v209_v40  ;;  %v223_v61 = vand.u32 4294901760, %v1392_v43 }
  0x2b   :  { %v204_v39 = vand.u32 4294901760, %v203_v32  ;;  %v217_v60 = vsub.f32 %v1388_v37, %v216_v41  ;;  %v230_v4 = vand.u32 4294901760, %v1394_v44  ;;  %v1307_v6 = vmov 0  }
  0x2c   :  { %1097 = vmatpush3.bf16.xpose.msra.mxu1 %v1370_v24  ;;  %1169 = vmatpush3.bf16.xpose.msra.mxu0 %v1370_v24  ;;  %v186_v49 = vand.u32 4294901760, %v185_v33  ;;  %v211_v63 = vand.u32 4294901760, %v210_v57  ;;  %v1189_v10 = vpack.c.bf16 %v216_v41, %v209_v40  ;;  %v224_v11 = vsub.f32 %v1392_v43, %v223_v61 }
  0x2d   :  { %1098 = vmatprep.subr.bf16.mxu1 %v1304_v0  ;;  %1170 = vmatprep.subr.bf16.mxu0 %v1304_v0  ;;  %v1114_v50 = vpack.c.bf16 %v204_v39, %v197_v38  ;;  %v218_v2 = vand.u32 4294901760, %v217_v60  ;;  %v231_v14 = vsub.f32 %v1394_v44, %v230_v4  ;;  %v237_v20 = vand.u32 4294901760, %v1397_v45 }
  0x2e   :  { %1250 = vset.pattern.permute.xlu0 %v1307_v6  ;;  %v225_v15 = vand.u32 4294901760, %v224_v11  ;;  %v244_v25 = vand.u32 4294901760, %v1400_v46  ;;  %v251_v39 = vand.u32 4294901760, %v1404_v47  ;;  %v258_v40 = vand.u32 4294901760, %v1406_v48 }
  0x2f   :  { %v1117_v9 = vpack.c.bf16 %v218_v2, %v211_v63  ;;  %746 = vperm.xlu0 %1250, %v742_v5   ;;  %v232_v19 = vand.u32 4294901760, %v231_v14  ;;  %v238_v30 = vsub.f32 %v1397_v45, %v237_v20  ;;  %v272_v63 = vand.u32 4294901760, %v1422_v59 }
  0x30   :  { %v245_v32 = vsub.f32 %v1400_v46, %v244_v25  ;;  %v279_v11 = vand.u32 4294901760, %v1437_v7  ;;  %v286_v14 = vand.u32 4294901760, %v1439_v8 }
  0x31   :  { %v1120_v26 = vpack.c.bf16 %v232_v19, %v225_v15  ;;  %v239_v33 = vand.u32 4294901760, %v238_v30  ;;  %v273_v6 = vsub.f32 %v1422_v59, %v272_v63  ;;  %v293_v30 = vand.u32 4294901760, %v1454_v21 }
  0x32   :  { %v246_v38 = vand.u32 4294901760, %v245_v32  ;;  %v300_v32 = vand.u32 4294901760, %v1456_v22 }
  0x34   :  { %1100 = vmatpush3.bf16.xpose.msra.mxu1 %v1378_v31  ;;  %1172 = vmatpush3.bf16.xpose.msra.mxu0 %v1378_v31  ;;  %v1123_v41 = vpack.c.bf16 %v246_v38, %v239_v33  ;;  %v1204_v38 = vpack.c.bf16 %v286_v14, %v279_v11 }
  0x35   :  { %1101 = vmatprep.subr.bf16.mxu1 %v1304_v0  ;;  %1173 = vmatprep.subr.bf16.mxu0 %v1304_v0 }
  0x3c   :  { %1103 = vmatpush3.bf16.xpose.msra.mxu1 %v1418_v55  ;;  %1175 = vmatpush3.bf16.xpose.msra.mxu0 %v1418_v55 }
  0x3d   :  { %1104 = vmatprep.subr.bf16.mxu1 %v1304_v0  ;;  %1176 = vmatprep.subr.bf16.mxu0 %v1304_v0 }
  0x44   :  { %1106 = vmatpush3.bf16.xpose.msra.mxu1 %v1432_v3  ;;  %1178 = vmatpush3.bf16.xpose.msra.mxu0 %v1432_v3 }
  0x45   :  { %1107 = vmatprep.subr.bf16.mxu1 %v1304_v0  ;;  %1179 = vmatprep.subr.bf16.mxu0 %v1304_v0 }
  0x4c   :  { %1109 = vmatpush3.bf16.xpose.msra.mxu1 %v1452_v18  ;;  %1181 = vmatpush3.bf16.xpose.msra.mxu0 %v1452_v18 }
  0x4d   :  { %1110 = vmatprep.subr.bf16.mxu1 %v1304_v0  ;;  %1182 = vmatprep.subr.bf16.mxu0 %v1304_v0 }
  0x54   :  { %1112 = vmatpush3.bf16.xpose.msra.mxu1 %v1470_v29  ;;  %1184 = vmatpush3.bf16.xpose.msra.mxu0 %v1470_v29 }
  0x55   :  { %1113 = vmatprep.subr.bf16.mxu1 %v1304_v0  ;;  %1185 = vmatprep.subr.bf16.mxu0 %v1304_v0 }
  0x5b   :  { %912 = vmatmul.mubr.f32.vlgmr.msra.gmra.mrb[0].mxu1 %v186_v49  ;;  %1017 = vmatmul.mubr.f32.vlgmr.msra.gmra.mrb[0].mxu0 %v184_v28  ;;  %v1192_v28 = vpack.c.bf16 %v230_v4, %v223_v61  ;;  %v1195_v49 = vpack.c.bf16 %v244_v25, %v237_v20  ;;  %v265_v61 = vand.u32 4294901760, %v1420_v58  ;;  %v1198_v4 = vpack.c.bf16 %v258_v40, %v251_v39 }
  0x5c   :  { %1115 = vmatpush3.bf16.xpose.msra.mxu1 %v1114_v50  ;;  %1187 = vmatpush3.bf16.xpose.msra.mxu0 %v1186_v56  ;;  %v252_v50 = vsub.f32 %v1404_v47, %v251_v39  ;;  %v259_v56 = vsub.f32 %v1406_v48, %v258_v40  ;;  %v280_v20 = vsub.f32 %v1437_v7, %v279_v11 }
  0x5d   :  { %1116 = vmatprep.subr.bf16.mxu1 %v1304_v0  ;;  %1188 = vmatprep.subr.bf16.mxu0 %v1304_v0  ;;  %v266_v5 = vsub.f32 %v1420_v58, %v265_v61  ;;  %v1201_v19 = vpack.c.bf16 %v272_v63, %v265_v61  ;;  %v287_v25 = vsub.f32 %v1439_v8, %v286_v14 }
  0x5e   :  { %946 = vmatprep.mubr.msk.f32.mxu1 %vm1305_vm0, %v1306_v1  ;;  %1051 = vmatprep.mubr.msk.f32.mxu0 %vm1305_vm0, %v1306_v1  ;;  %v253_v57 = vand.u32 4294901760, %v252_v50  ;;  %v260_v60 = vand.u32 4294901760, %v259_v56  ;;  %v294_v39 = vsub.f32 %v1454_v21, %v293_v30  ;;  %v301_v40 = vsub.f32 %v1456_v22, %v300_v32 }
  0x5f   :  { %v1207_v56 = vpack.c.bf16 %v300_v32, %v293_v30 }
  0x60   :  { %v1126_v2 = vpack.c.bf16 %v260_v60, %v253_v57 }
  0x64   :  { %1118 = vmatpush3.bf16.xpose.msra.mxu1 %v1117_v9  ;;  %1190 = vmatpush3.bf16.xpose.msra.mxu0 %v1189_v10  ;;  %v267_v9 = vand.u32 4294901760, %v266_v5  ;;  %v274_v10 = vand.u32 4294901760, %v273_v6 }
  0x65   :  { %1119 = vmatprep.subr.bf16.mxu1 %v1304_v0  ;;  %1191 = vmatprep.subr.bf16.mxu0 %v1304_v0 }
  0x66   :  { %v1129_v15 = vpack.c.bf16 %v274_v10, %v267_v9 }
  0x6c   :  { %1121 = vmatpush3.bf16.xpose.msra.mxu1 %v1120_v26  ;;  %1193 = vmatpush3.bf16.xpose.msra.mxu0 %v1192_v28  ;;  %v281_v26 = vand.u32 4294901760, %v280_v20  ;;  %v288_v28 = vand.u32 4294901760, %v287_v25 }
  0x6d   :  { %1122 = vmatprep.subr.bf16.mxu1 %v1304_v0  ;;  %1194 = vmatprep.subr.bf16.mxu0 %v1304_v0 }
  0x6e   :  { %v1132_v33 = vpack.c.bf16 %v288_v28, %v281_v26 }
  0x74   :  { %1124 = vmatpush3.bf16.xpose.msra.mxu1 %v1123_v41  ;;  %1196 = vmatpush3.bf16.xpose.msra.mxu0 %v1195_v49  ;;  %v295_v41 = vand.u32 4294901760, %v294_v39  ;;  %v302_v49 = vand.u32 4294901760, %v301_v40 }
  0x75   :  { %1125 = vmatprep.subr.bf16.mxu1 %v1304_v0  ;;  %1197 = vmatprep.subr.bf16.mxu0 %v1304_v0 }
  0x76   :  { %v1135_v50 = vpack.c.bf16 %v302_v49, %v295_v41 }
  0x7c   :  { %1127 = vmatpush3.bf16.xpose.msra.mxu1 %v1126_v2  ;;  %1199 = vmatpush3.bf16.xpose.msra.mxu0 %v1198_v4 }
  0x7d   :  { %1128 = vmatprep.subr.bf16.mxu1 %v1304_v0  ;;  %1200 = vmatprep.subr.bf16.mxu0 %v1304_v0 }
  0x84   :  { %1130 = vmatpush3.bf16.xpose.msra.mxu1 %v1129_v15  ;;  %1202 = vmatpush3.bf16.xpose.msra.mxu0 %v1201_v19 }
  0x85   :  { %1131 = vmatprep.subr.bf16.mxu1 %v1304_v0  ;;  %1203 = vmatprep.subr.bf16.mxu0 %v1304_v0 }
  0x8c   :  { %1133 = vmatpush3.bf16.xpose.msra.mxu1 %v1132_v33  ;;  %1205 = vmatpush3.bf16.xpose.msra.mxu0 %v1204_v38 }
  0x8d   :  { %1134 = vmatprep.subr.bf16.mxu1 %v1304_v0  ;;  %1206 = vmatprep.subr.bf16.mxu0 %v1304_v0 }
  0x94   :  { %1136 = vmatpush3.bf16.xpose.msra.mxu1 %v1135_v50  ;;  %1208 = vmatpush3.bf16.xpose.msra.mxu0 %v1207_v56 }
  0x95   :  { %1137 = vmatprep.subr.bf16.mxu1 %v1304_v0  ;;  %1209 = vmatprep.subr.bf16.mxu0 %v1304_v0 }
  0x9b   :  { %947 = vmatmul.mubr.f32.vlgmr.msra.gmra.mrb[0].mxu1 %v1450_v16  ;;  %1052 = vmatmul.mubr.f32.vlgmr.msra.gmra.mrb[0].mxu0 %v1450_v16 }
  0x9c   :  { %1139 = vmatpush3.bf16.xpose.msra.mxu1 %v1138_v42  ;;  %1211 = vmatpush3.bf16.xpose.msra.mxu0 %v1356_v12 }
  0x9d   :  { %1140 = vmatprep.subr.bf16.mxu1 %v1304_v0  ;;  %1212 = vmatprep.subr.bf16.mxu0 %v1304_v0 }
  0x9e   :  { %981 = vmatprep.mubr.msk.f32.mxu1 %vm1305_vm0, %v1306_v1  ;;  %1086 = vmatprep.mubr.msk.f32.mxu0 %vm1305_vm0, %v1306_v1  ;;  %v776_v1 = vld [vmem:[%s1602_s3] ss:$0 sm:$0xff] }
  0xa4   :  { %1142 = vmatpush3.bf16.xpose.msra.mxu1 %v1141_v51  ;;  %1214 = vmatpush3.bf16.xpose.msra.mxu0 %v1362_v17 }
  0xa5   :  { %1143 = vmatprep.subr.bf16.mxu1 %v1304_v0  ;;  %1215 = vmatprep.subr.bf16.mxu0 %v1304_v0 }
  0xac   :  { %1145 = vmatpush3.bf16.xpose.msra.mxu1 %v1144_v52  ;;  %1217 = vmatpush3.bf16.xpose.msra.mxu0 %v1370_v24 }
  0xad   :  { %1146 = vmatprep.subr.bf16.mxu1 %v1304_v0  ;;  %1218 = vmatprep.subr.bf16.mxu0 %v1304_v0 }
  0xae   :  { %v747_v12 = vpop.permute.xlu0 %746 }
  0xaf   :  { %v755_v17 = vmul.f32 %v776_v1, %v747_v12 }
  0xb1   :  { %v756_v24 = vmax.f32 %v755_v17, 1e-16 }
  0xb3   :  { %1251 = vrsqrt.f32 %v756_v24 }
  0xb4   :  { %1148 = vmatpush3.bf16.xpose.msra.mxu1 %v1147_v53  ;;  %1220 = vmatpush3.bf16.xpose.msra.mxu0 %v1378_v31 }
  0xb5   :  { %1149 = vmatprep.subr.bf16.mxu1 %v1304_v0  ;;  %1221 = vmatprep.subr.bf16.mxu0 %v1304_v0 }
  0xbc   :  { %1151 = vmatpush3.bf16.xpose.msra.mxu1 %v1150_v54  ;;  %1223 = vmatpush3.bf16.xpose.msra.mxu0 %v1418_v55 }
  0xbd   :  { %1152 = vmatprep.subr.bf16.mxu1 %v1304_v0  ;;  %1224 = vmatprep.subr.bf16.mxu0 %v1304_v0  ;;  %v1252_v31 = vpop.eup %1251 }
  0xc4   :  { %1154 = vmatpush3.bf16.xpose.msra.mxu1 %v1153_v62  ;;  %1226 = vmatpush3.bf16.xpose.msra.mxu0 %v1432_v3 }
  0xc5   :  { %1155 = vmatprep.subr.bf16.mxu1 %v1304_v0  ;;  %1227 = vmatprep.subr.bf16.mxu0 %v1304_v0 }
  0xcc   :  { %1157 = vmatpush3.bf16.xpose.msra.mxu1 %v1156_v13  ;;  %1229 = vmatpush3.bf16.xpose.msra.mxu0 %v1452_v18 }
  0xcd   :  { %1158 = vmatprep.subr.bf16.mxu1 %v1304_v0  ;;  %1230 = vmatprep.subr.bf16.mxu0 %v1304_v0 }
  0xd4   :  { %1160 = vmatpush3.bf16.xpose.msra.mxu1 %v1159_v27  ;;  %1232 = vmatpush3.bf16.xpose.msra.mxu0 %v1470_v29 }
  0xdb   :  { %982 = vmatmul.mubr.f32.vlgmr.msra.gmra.mrb[0].mxu1 %v1459_v23  ;;  %1087 = vmatmul.mubr.f32.vlgmr.msra.gmra.mrb[0].mxu0 %v1450_v16 }
 0x1ae   :  { %v443_v0 = vpop.f32.mrb[0].mxu1  ;;  %v738_v34 = vpop.f32.mrb[0].mxu0 }
 0x1af   :  { %v1233_v35 = vadd.f32 %v738_v34, %v443_v0  ;;  %v983_v36 = vpop.f32.mrb[1].mxu1  ;;  %v1088_v37 = vpop.f32.mrb[1].mxu0 }
 0x1b1   :  { %v758_v42 = vmul.f32 %v1252_v31, %v1233_v35 }
 0x1b3   :  { %v759_v43 = vmul.f32 20.0, %v758_v42 }
 0x1b5   :  { %760 = vst [vmem:[#allocation5] sm:$0xff] %v759_v43 }
 0x1b6   :  { %1286 = shalt.err (!%p1283_p12)
}
 0x1b7   :  { %s1287_s11 = scalar_lea.hbm %s1603_s4, 128 }
 0x1b8   :  { %p1288_p13 = scmp.ne.s32.totalorder %s1603_s4, %s1287_s11  ;;  %p1291_p0 = scmp.lt.u32.totalorder %s1287_s11, %s1603_s4 }
 0x1ba   :  { %p1293_p1 = pnand %p1291_p0, %p1288_p13 }
 0x1bc   :  { %1296 = shalt.err (!%p1293_p1)
}
 0x1bd   :  { %770 = dma.vmem_to_hbm [thread:$0]  %s768_s8, 128, %s1603_s4, [#allocation4]  }
 0x1be   :  { %1299 = dma.done.wait [#allocation4], 128  }
 0x1bf   :  { %1300 = vsyncadd [#allocation4], 4294967168 }
 0x1c0   :  { %774 = vsyncpa [#allocation3], 1 }
 0x1c1   :  { %775 = vsyncpa [#allocation4], 1 }

</bundles_post_ra>
